<compile_context>
chip_gen: v6e
topology: v6e:2x2x1
jax: 0.10.0
libtpu: 0.0.40
codegen_flags: <defaults>
</compile_context>

<pallas_src>
import jax
import jax.numpy as jnp
from jax.experimental import pallas as pl
from jax.experimental.pallas import tpu as pltpu

_LANE = 128
_MAX_TILE = 1024                 # per-axis tile budget (perf review: grow toward 1024)
_FOLD_SLAB_BYTES = 1 << 20       # fold batches when a full (T, C) slab is < 1 MiB
_FOLD_BLOCK_BYTES = 4 << 20      # target <= 4 MiB per folded block
_VMEM_CAP_BYTES = 48 << 20       # stay well under v7x's 64 MiB physical VMEM


def _round_up(n, m):
    return ((n + m - 1) // m) * m


def _pick_tile(dim, max_tile):
    """Largest multiple of 128 that divides `dim` and is <= max_tile (requires dim % 128 == 0)."""
    t = min(dim, max_tile)
    t -= t % _LANE
    while dim % t:
        t -= _LANE
    return t


def _pick_batch_fold(B, slab_bytes):
    """How many batch elements to fold into one block (block sized ~1-4 MiB)."""
    best = 1
    for b in range(1, B + 1):
        if B % b == 0 and b * slab_bytes <= _FOLD_BLOCK_BYTES:
            best = b
    # Prefer >= 2 grid steps (v7x has 2 TensorCores) as long as each block stays >= 1 MiB.
    if best == B and B > 1:
        for cand in range(B // 2, 0, -1):
            if B % cand == 0:
                if cand * slab_bytes >= (1 << 20):
                    best = cand
                break
    return best


def _swap_last2_kernel(x_ref, o_ref):
    # Handles both the 2-D tiled path ((tT, tC) -> (tC, tT)) and the batch-folded
    # path ((bB, T, C) -> (bB, C, T)); pure on-chip XLU transpose of the last 2 axes.
    o_ref[...] = jnp.swapaxes(x_ref[...], -2, -1)


def transpose_last2(x, *, max_tile_t=_MAX_TILE, max_tile_c=_MAX_TILE):
    """Swap the last two axes of a 3-D array (B, T, C) -> (B, C, T) via a Pallas kernel.

    Requires T % 128 == 0 and C % 128 == 0 (the dispatcher pads if needed).
    """
    B, T, C = x.shape
    assert T % _LANE == 0 and C % _LANE == 0, (T, C)
    itemsize = jnp.dtype(x.dtype).itemsize

    tT = _pick_tile(T, max_tile_t)
    tC = _pick_tile(C, max_tile_c)
    slab_bytes = T * C * itemsize

    cost = pl.CostEstimate(flops=0, transcendentals=0,
                           bytes_accessed=2 * B * T * C * itemsize)

    if tT == T and tC == C and slab_bytes <= _FOLD_SLAB_BYTES:
        # Batch-folded path: amortize the ~0.35 us per-grid-step overhead on the small
        # (B, ~256, ~256)-class shapes this module actually sees.
        bB = _pick_batch_fold(B, slab_bytes)
        grid = (B // bB,)
        in_specs = [pl.BlockSpec((bB, T, C), lambda b: (b, 0, 0))]
        out_specs = pl.BlockSpec((bB, C, T), lambda b: (b, 0, 0))
        tile_bytes = bB * slab_bytes
        dim_sem = ("parallel",)
    else:
        # Tiled path; ti is the fastest-varying grid axis so the output writeback
        # sweeps its contiguous last dim (T) sequentially.
        grid = (B, C // tC, T // tT)
        in_specs = [pl.BlockSpec((pl.Squeezed(), tT, tC),
                                 lambda b, ci, ti: (b, ti, ci))]
        out_specs = pl.BlockSpec((pl.Squeezed(), tC, tT),
                                 lambda b, ci, ti: (b, ci, ti))
        tile_bytes = tT * tC * itemsize
        dim_sem = ("parallel", "parallel", "parallel")

    # Size VMEM from the actual tiles: 2x double-buffered input + 2x output + slack.
    vmem_limit = int(min(_VMEM_CAP_BYTES,
                         max(16 << 20, 4 * tile_bytes + (2 << 20))))

    return pl.pallas_call(
        _swap_last2_kernel,
        out_shape=jax.ShapeDtypeStruct((B, C, T), x.dtype),
        grid_spec=pltpu.PrefetchScalarGridSpec(
            num_scalar_prefetch=0,
            grid=grid,
            in_specs=in_specs,
            out_specs=out_specs,
        ),
        compiler_params=pltpu.CompilerParams(
            dimension_semantics=dim_sem,
            vmem_limit_bytes=vmem_limit,
        ),
        cost_estimate=cost,
    )(x)


class Transpose:
    """JAX/Pallas equivalent of the PyTorch Transpose(dim_1, dim_2) module."""

    def __init__(self, dim_1, dim_2):
        self.dim_1 = dim_1
        self.dim_2 = dim_2

    def __call__(self, x):
        nd = x.ndim
        d1 = self.dim_1 % nd
        d2 = self.dim_2 % nd
        if d1 == d2:
            return x
        if nd >= 2 and {d1, d2} == {nd - 2, nd - 1}:
            T, C = x.shape[-2], x.shape[-1]
            Tp, Cp = _round_up(T, _LANE), _round_up(C, _LANE)
            # Kernel path whenever the pad-to-128 overhead is modest (covers real,
            # non-128-multiple sequence lengths); tiny shapes are cheaper via XLA.
            if (Tp * Cp) <= 2 * (T * C):
                lead = x.shape[:-2]
                xb = x if nd == 3 else x.reshape((-1, T, C))
                if (Tp, Cp) != (T, C):
                    xb = jnp.pad(xb, ((0, 0), (0, Tp - T), (0, Cp - C)))
                yb = transpose_last2(xb)
                if (Tp, Cp) != (T, C):
                    yb = yb[:, :C, :T]
                return yb.reshape(lead + (C, T))
        # TODO(synk): general non-adjacent-axis transpose is pure data movement with no
        # single rectangular-tile Pallas kernel; fall back to XLA for that rare case.
        return jnp.swapaxes(x, self.dim_1, self.dim_2)


if __name__ == "__main__":
    key = jax.random.PRNGKey(0)
    k0, k1, k2, k3 = jax.random.split(key, 4)
    module = Transpose(-1, -2)

    # 1) Tiny FastSpeech2-like shape (batch=2, seq=8, hidden=32): dispatcher falls back to XLA.
    x_small = jax.random.normal(k0, (2, 8, 32), dtype=jnp.float32)
    y_small = jax.block_until_ready(module(x_small))
    assert bool(jnp.array_equal(y_small, jnp.swapaxes(x_small, -1, -2))), "fallback mismatch"

    # 2) Lane-friendly shape (batch=2, seq=256, hidden=128): batch-folded kernel path.
    x = jax.random.normal(k1, (2, 256, 128), dtype=jnp.float32)
    ref = jnp.swapaxes(x, -1, -2)
    y = jax.block_until_ready(module(x))
    assert y.shape == ref.shape and y.dtype == ref.dtype, (y.shape, y.dtype)
    assert bool(jnp.array_equal(y, ref)), "transpose mismatch (folded kernel path)"

    # 2b) Force the multi-tile path (grid=(2, 1, 2)) to exercise the swapped index maps.
    y_tiled = jax.block_until_ready(transpose_last2(x, max_tile_t=128, max_tile_c=128))
    assert bool(jnp.array_equal(y_tiled, ref)), "transpose mismatch (multi-tile path)"

    # 2c) bf16 (sublane-packed) through the same kernel.
    xb16 = x.astype(jnp.bfloat16)
    yb16 = jax.block_until_ready(module(xb16))
    assert bool(jnp.array_equal(yb16, jnp.swapaxes(xb16, -1, -2))), "bf16 transpose mismatch"

    # 3) Non-128-multiple sequence length (real FastSpeech2 lengths): padded kernel path.
    x_rag = jax.random.normal(k2, (2, 200, 128), dtype=jnp.float32)
    y_rag = jax.block_until_ready(module(x_rag))
    assert bool(jnp.array_equal(y_rag, jnp.swapaxes(x_rag, -1, -2))), "padded-path mismatch"

    # 4) 4-D leading-batch case routed through the same kernel (reshape to (-1, T, C)).
    x4 = jax.random.normal(k3, (2, 4, 128, 128), dtype=jnp.float32)
    y4 = jax.block_until_ready(module(x4))
    assert bool(jnp.array_equal(y4, jnp.swapaxes(x4, -1, -2))), "4-D transpose mismatch"

    print("KERNEL_OK")
</pallas_src>

<mosaic_0001>
module attributes {stable_mosaic.version = 11 : i64} {
  func.func @_swap_last2_kernel(%arg0: i32, %arg1: memref<2x256x128xf32, #tpu.memory_space<vmem>>, %arg2: memref<2x128x256xf32, #tpu.memory_space<vmem>>) attributes {dimension_semantics = [#tpu.dimension_semantics<parallel>], iteration_bounds = array<i64: 1>, scalar_prefetch = 0 : i64, scratch_operands = 0 : i64, tpu.core_type = #tpu.core_type<tc>, window_params = [{transform_indices = @transform_0, window_bounds = array<i64: 2, 256, 128>}, {transform_indices = @transform_1, window_bounds = array<i64: 2, 128, 256>}]} {
    %c0 = arith.constant 0 : index
    %c0_0 = arith.constant 0 : index
    %c0_1 = arith.constant 0 : index
    %0 = vector.load %arg1[%c0, %c0_0, %c0_1] : memref<2x256x128xf32, #tpu.memory_space<vmem>>, vector<2x256x128xf32>
    %1 = tpu.transpose %0, [0, 2, 1] : vector<2x256x128xf32> -> vector<2x128x256xf32>
    %c0_2 = arith.constant 0 : index
    %c0_3 = arith.constant 0 : index
    %c0_4 = arith.constant 0 : index
    %2 = vector.load %arg2[%c0_2, %c0_3, %c0_4] : memref<2x128x256xf32, #tpu.memory_space<vmem>>, vector<2x128x256xf32>
    tpu.vector_store %arg2[%c0_2, %c0_3, %c0_4], %1 {strides = array<i32>} : memref<2x128x256xf32, #tpu.memory_space<vmem>>, vector<2x128x256xf32>,
    return
  }
  func.func @transform_0(%arg0: i32) -> (i32, i32, i32) {
    %c0_i32 = arith.constant 0 : i32
    %c0_i32_0 = arith.constant 0 : i32
    %c0_i32_1 = arith.constant 0 : i32
    return %arg0, %c0_i32, %c0_i32_0 : i32, i32, i32
  }
  func.func @transform_1(%arg0: i32) -> (i32, i32, i32) {
    %c0_i32 = arith.constant 0 : i32
    %c0_i32_0 = arith.constant 0 : i32
    %c0_i32_1 = arith.constant 0 : i32
    return %arg0, %c0_i32, %c0_i32_0 : i32, i32, i32
  }
}

</mosaic_0001>

<bundles_post_ra>
// kernel: tpu_custom_call.1
= control target key start
LH: loop header
LB: loop body
LE: loop exit
PB: predicated region body
PF: predicated region fallthrough
CT: control target
= control target key end

     0   :  { %6 = vsyncpa [#allocation3], 0  ;;  %s368_s0 = inlined_call_operand.hbm [shape: f32[2,256,128], index: 0, kind: input, shape index: {}]   ;;  %s369_s1 = inlined_call_operand.hbm [shape: f32[2,128,256], index: 1, kind: output, shape index: {}]  }
   0x1   :  { %7 = vsyncpa [#allocation4], 0  ;;  %s346_s6 = smov [#allocation2]  }
   0x2   :  { %s13_s7 = sshll.u32 %s346_s6, 4  ;;  %s14_s7 = int_to_ptr.vmem [resolvable:$true] %s13_s7 }
   0x3   :  { %s310_s8 = scalar_lea.vmem %s14_s7, 8192  ;;  %p315_p1 = scmp.lt.s32.totalorder %s14_s7, %s14_s7 }
   0x4   :  { %p311_p0 = scmp.ne.s32.totalorder %s14_s7, %s310_s8  ;;  %p316_p2 = scmp.lt.s32.totalorder %s310_s8, %s310_s8 }
   0x6   :  { %p317_p3 = por %p316_p2, %p315_p1 }
   0x8   :  { %p318_p4 = pnand %p317_p3, %p311_p0 }
   0xa   :  { %321 = shalt.err (!%p318_p4)
}
   0xb   :  { %s347_s9 = smov 128   ;;  %s348_s10 = smov 8  }
   0xc   :  { %19 = dma.hbm_to_vmem [thread:$0]  %s368_s0, 8192, %s14_s7, [#allocation3], %s347_s9, %s347_s9, %s348_s10  }
   0xd   :  { %342 = dma.done.wait [#allocation3], 8192  }
   0xe   :  { %343 = vsyncadd [#allocation3], 4294959104  ;;  %v39_v0 = vld [vmem:[#allocation2 + $0x80] sm:$0xff]  ;;  %v40_v2 = vld [vmem:[#allocation2 + $0x88] sm:$0xff]  ;;  %s349_s0 = smov [#allocation5]  }
   0xf   :  { %v23_v1 = vld [vmem:[#allocation2] sm:$0xff]  ;;  %119 = vxpose.xlu1.b32.start [1/16] %v39_v0, 128  ;;  %v24_v3 = vld [vmem:[#allocation2 + $0x8] sm:$0xff]  ;;  %v41_v4 = vld [vmem:[#allocation2 + $0x90] sm:$0xff]  ;;  %s284_s13 = sshll.u32 %s349_s0, 4  ;;  %s285_s13 = int_to_ptr.vmem [resolvable:$true] %s284_s13 }
  0x10   :  { %87 = vxpose.xlu0.b32.start [1/16] %v23_v1, 128  ;;  %v25_v5 = vld [vmem:[#allocation2 + $0x10] sm:$0xff]  ;;  %v42_v6 = vld [vmem:[#allocation2 + $0x98] sm:$0xff]  ;;  %v43_v8 = vld [vmem:[#allocation2 + $0xa0] sm:$0xff]  ;;  %s322_s14 = scalar_lea.vmem %s285_s13, 8192  ;;  %p327_p6 = scmp.lt.s32.totalorder %s285_s13, %s285_s13 }
  0x11   :  { %v26_v7 = vld [vmem:[#allocation2 + $0x18] sm:$0xff]  ;;  %v27_v9 = vld [vmem:[#allocation2 + $0x20] sm:$0xff]  ;;  %v44_v10 = vld [vmem:[#allocation2 + $0xa8] sm:$0xff]  ;;  %p323_p5 = scmp.ne.s32.totalorder %s285_s13, %s322_s14  ;;  %p328_p7 = scmp.lt.s32.totalorder %s322_s14, %s322_s14 }
  0x12   :  { %v28_v11 = vld [vmem:[#allocation2 + $0x28] sm:$0xff]  ;;  %v45_v12 = vld [vmem:[#allocation2 + $0xb0] sm:$0xff]  ;;  %v46_v14 = vld [vmem:[#allocation2 + $0xb8] sm:$0xff] }
  0x13   :  { %120 = vxpose.xlu1.b32.cont [2/16] %v40_v2, 128  ;;  %v29_v13 = vld [vmem:[#allocation2 + $0x30] sm:$0xff]  ;;  %v30_v15 = vld [vmem:[#allocation2 + $0x38] sm:$0xff]  ;;  %v47_v16 = vld [vmem:[#allocation2 + $0xc0] sm:$0xff]  ;;  %p329_p8 = por %p328_p7, %p327_p6 }
  0x14   :  { %88 = vxpose.xlu0.b32.cont [2/16] %v24_v3, 128  ;;  %v31_v17 = vld [vmem:[#allocation2 + $0x40] sm:$0xff]  ;;  %v48_v18 = vld [vmem:[#allocation2 + $0xc8] sm:$0xff]  ;;  %v49_v20 = vld [vmem:[#allocation2 + $0xd0] sm:$0xff] }
  0x15   :  { %v32_v19 = vld [vmem:[#allocation2 + $0x48] sm:$0xff]  ;;  %v33_v21 = vld [vmem:[#allocation2 + $0x50] sm:$0xff]  ;;  %v50_v22 = vld [vmem:[#allocation2 + $0xd8] sm:$0xff]  ;;  %p330_p9 = pnand %p329_p8, %p323_p5 }
  0x16   :  { %v34_v23 = vld [vmem:[#allocation2 + $0x58] sm:$0xff]  ;;  %v51_v24 = vld [vmem:[#allocation2 + $0xe0] sm:$0xff]  ;;  %v52_v26 = vld [vmem:[#allocation2 + $0xe8] sm:$0xff] }
  0x17   :  { %121 = vxpose.xlu1.b32.cont [3/16] %v41_v4, 128  ;;  %v35_v25 = vld [vmem:[#allocation2 + $0x60] sm:$0xff]  ;;  %v36_v27 = vld [vmem:[#allocation2 + $0x68] sm:$0xff]  ;;  %v53_v28 = vld [vmem:[#allocation2 + $0xf0] sm:$0xff] }
  0x18   :  { %89 = vxpose.xlu0.b32.cont [3/16] %v25_v5, 128  ;;  %v37_v29 = vld [vmem:[#allocation2 + $0x70] sm:$0xff]  ;;  %v54_v30 = vld [vmem:[#allocation2 + $0xf8] sm:$0xff]  ;;  %v71_v32 = vld [vmem:[#allocation2 + $0x180] sm:$0xff] }
  0x19   :  { %v38_v31 = vld [vmem:[#allocation2 + $0x78] sm:$0xff]  ;;  %v55_v33 = vld [vmem:[#allocation2 + $0x100] sm:$0xff]  ;;  %v72_v34 = vld [vmem:[#allocation2 + $0x188] sm:$0xff] }
  0x1a   :  { %v56_v35 = vld [vmem:[#allocation2 + $0x108] sm:$0xff]  ;;  %v73_v36 = vld [vmem:[#allocation2 + $0x190] sm:$0xff]  ;;  %v74_v38 = vld [vmem:[#allocation2 + $0x198] sm:$0xff] }
  0x1b   :  { %122 = vxpose.xlu1.b32.cont [4/16] %v42_v6, 128  ;;  %v57_v37 = vld [vmem:[#allocation2 + $0x110] sm:$0xff]  ;;  %v58_v39 = vld [vmem:[#allocation2 + $0x118] sm:$0xff]  ;;  %v75_v40 = vld [vmem:[#allocation2 + $0x1a0] sm:$0xff] }
  0x1c   :  { %90 = vxpose.xlu0.b32.cont [4/16] %v26_v7, 128  ;;  %v59_v41 = vld [vmem:[#allocation2 + $0x120] sm:$0xff]  ;;  %v76_v42 = vld [vmem:[#allocation2 + $0x1a8] sm:$0xff]  ;;  %v77_v44 = vld [vmem:[#allocation2 + $0x1b0] sm:$0xff] }
  0x1d   :  { %v60_v43 = vld [vmem:[#allocation2 + $0x128] sm:$0xff]  ;;  %v61_v45 = vld [vmem:[#allocation2 + $0x130] sm:$0xff]  ;;  %v78_v46 = vld [vmem:[#allocation2 + $0x1b8] sm:$0xff] }
  0x1e   :  { %v62_v47 = vld [vmem:[#allocation2 + $0x138] sm:$0xff]  ;;  %v79_v48 = vld [vmem:[#allocation2 + $0x1c0] sm:$0xff]  ;;  %v80_v50 = vld [vmem:[#allocation2 + $0x1c8] sm:$0xff] }
  0x1f   :  { %123 = vxpose.xlu1.b32.cont [5/16] %v43_v8, 128  ;;  %v63_v49 = vld [vmem:[#allocation2 + $0x140] sm:$0xff]  ;;  %v64_v51 = vld [vmem:[#allocation2 + $0x148] sm:$0xff]  ;;  %v81_v52 = vld [vmem:[#allocation2 + $0x1d0] sm:$0xff] }
  0x20   :  { %91 = vxpose.xlu0.b32.cont [5/16] %v27_v9, 128  ;;  %v65_v53 = vld [vmem:[#allocation2 + $0x150] sm:$0xff]  ;;  %v82_v54 = vld [vmem:[#allocation2 + $0x1d8] sm:$0xff]  ;;  %v83_v56 = vld [vmem:[#allocation2 + $0x1e0] sm:$0xff] }
  0x21   :  { %v66_v55 = vld [vmem:[#allocation2 + $0x158] sm:$0xff]  ;;  %v67_v57 = vld [vmem:[#allocation2 + $0x160] sm:$0xff]  ;;  %v84_v58 = vld [vmem:[#allocation2 + $0x1e8] sm:$0xff] }
  0x22   :  { %v68_v59 = vld [vmem:[#allocation2 + $0x168] sm:$0xff]  ;;  %v85_v60 = vld [vmem:[#allocation2 + $0x1f0] sm:$0xff]  ;;  %v86_v62 = vld [vmem:[#allocation2 + $0x1f8] sm:$0xff] }
  0x23   :  { %124 = vxpose.xlu1.b32.cont [6/16] %v44_v10, 128  ;;  %v69_v61 = vld [vmem:[#allocation2 + $0x170] sm:$0xff]  ;;  %v70_v63 = vld [vmem:[#allocation2 + $0x178] sm:$0xff] }
  0x24   :  { %92 = vxpose.xlu0.b32.cont [6/16] %v28_v11, 128 }
  0x27   :  { %125 = vxpose.xlu1.b32.cont [7/16] %v45_v12, 128 }
  0x28   :  { %93 = vxpose.xlu0.b32.cont [7/16] %v29_v13, 128 }
  0x2b   :  { %126 = vxpose.xlu1.b32.cont [8/16] %v46_v14, 128 }
  0x2c   :  { %94 = vxpose.xlu0.b32.cont [8/16] %v30_v15, 128 }
  0x2f   :  { %127 = vxpose.xlu1.b32.cont [9/16] %v47_v16, 128 }
  0x30   :  { %95 = vxpose.xlu0.b32.cont [9/16] %v31_v17, 128 }
  0x33   :  { %128 = vxpose.xlu1.b32.cont [10/16] %v48_v18, 128 }
  0x34   :  { %96 = vxpose.xlu0.b32.cont [10/16] %v32_v19, 128 }
  0x37   :  { %129 = vxpose.xlu1.b32.cont [11/16] %v49_v20, 128 }
  0x38   :  { %97 = vxpose.xlu0.b32.cont [11/16] %v33_v21, 128 }
  0x3b   :  { %130 = vxpose.xlu1.b32.cont [12/16] %v50_v22, 128 }
  0x3c   :  { %98 = vxpose.xlu0.b32.cont [12/16] %v34_v23, 128 }
  0x3f   :  { %131 = vxpose.xlu1.b32.cont [13/16] %v51_v24, 128 }
  0x40   :  { %99 = vxpose.xlu0.b32.cont [13/16] %v35_v25, 128 }
  0x43   :  { %132 = vxpose.xlu1.b32.cont [14/16] %v52_v26, 128 }
  0x44   :  { %100 = vxpose.xlu0.b32.cont [14/16] %v36_v27, 128 }
  0x47   :  { %133 = vxpose.xlu1.b32.cont [15/16] %v53_v28, 128 }
  0x48   :  { %101 = vxpose.xlu0.b32.cont [15/16] %v37_v29, 128 }
  0x4b   :  { %134 = vxpose.xlu1.b32.end [16/16] %v54_v30, 128 }
  0x4c   :  { %102 = vxpose.xlu0.b32.end [16/16] %v38_v31, 128 }
  0x4f   :  { %183 = vxpose.xlu1.b32.start [1/16] %v71_v32, 128 }
  0x50   :  { %151 = vxpose.xlu0.b32.start [1/16] %v55_v33, 128 }
  0x53   :  { %184 = vxpose.xlu1.b32.cont [2/16] %v72_v34, 128 }
  0x54   :  { %152 = vxpose.xlu0.b32.cont [2/16] %v56_v35, 128 }
  0x57   :  { %185 = vxpose.xlu1.b32.cont [3/16] %v73_v36, 128 }
  0x58   :  { %153 = vxpose.xlu0.b32.cont [3/16] %v57_v37, 128 }
  0x5b   :  { %186 = vxpose.xlu1.b32.cont [4/16] %v74_v38, 128 }
  0x5c   :  { %154 = vxpose.xlu0.b32.cont [4/16] %v58_v39, 128 }
  0x5f   :  { %187 = vxpose.xlu1.b32.cont [5/16] %v75_v40, 128 }
  0x60   :  { %155 = vxpose.xlu0.b32.cont [5/16] %v59_v41, 128 }
  0x63   :  { %188 = vxpose.xlu1.b32.cont [6/16] %v76_v42, 128 }
  0x64   :  { %156 = vxpose.xlu0.b32.cont [6/16] %v60_v43, 128 }
  0x67   :  { %189 = vxpose.xlu1.b32.cont [7/16] %v77_v44, 128 }
  0x68   :  { %157 = vxpose.xlu0.b32.cont [7/16] %v61_v45, 128 }
  0x6b   :  { %190 = vxpose.xlu1.b32.cont [8/16] %v78_v46, 128 }
  0x6c   :  { %158 = vxpose.xlu0.b32.cont [8/16] %v62_v47, 128 }
  0x6f   :  { %191 = vxpose.xlu1.b32.cont [9/16] %v79_v48, 128 }
  0x70   :  { %159 = vxpose.xlu0.b32.cont [9/16] %v63_v49, 128 }
  0x73   :  { %192 = vxpose.xlu1.b32.cont [10/16] %v80_v50, 128 }
  0x74   :  { %160 = vxpose.xlu0.b32.cont [10/16] %v64_v51, 128 }
  0x77   :  { %193 = vxpose.xlu1.b32.cont [11/16] %v81_v52, 128 }
  0x78   :  { %161 = vxpose.xlu0.b32.cont [11/16] %v65_v53, 128 }
  0x7b   :  { %194 = vxpose.xlu1.b32.cont [12/16] %v82_v54, 128 }
  0x7c   :  { %162 = vxpose.xlu0.b32.cont [12/16] %v66_v55, 128 }
  0x7f   :  { %195 = vxpose.xlu1.b32.cont [13/16] %v83_v56, 128 }
  0x80   :  { %163 = vxpose.xlu0.b32.cont [13/16] %v67_v57, 128 }
  0x83   :  { %196 = vxpose.xlu1.b32.cont [14/16] %v84_v58, 128 }
  0x84   :  { %164 = vxpose.xlu0.b32.cont [14/16] %v68_v59, 128 }
  0x87   :  { %197 = vxpose.xlu1.b32.cont [15/16] %v85_v60, 128 }
  0x88   :  { %165 = vxpose.xlu0.b32.cont [15/16] %v69_v61, 128 }
  0x8b   :  { %198 = vxpose.xlu1.b32.end [16/16] %v86_v62, 128  ;;  %v135_v0 = vpop.trf.xlu1 }
  0x8c   :  { %166 = vxpose.xlu0.b32.end [16/16] %v70_v63, 128  ;;  %v103_v1 = vpop.trf.xlu0  ;;  %216 = vst [vmem:[#allocation5 + $0x8] sm:$0xff] %v135_v0 }
  0x8d   :  { %215 = vst [vmem:[#allocation5] sm:$0xff] %v103_v1 }
  0x8f   :  { %v136_v2 = vpop.trf.xlu1 }
  0x90   :  { %v104_v3 = vpop.trf.xlu0  ;;  %218 = vst [vmem:[#allocation5 + $0x18] sm:$0xff] %v136_v2 }
  0x91   :  { %217 = vst [vmem:[#allocation5 + $0x10] sm:$0xff] %v104_v3 }
  0x93   :  { %v137_v4 = vpop.trf.xlu1 }
  0x94   :  { %v105_v5 = vpop.trf.xlu0  ;;  %220 = vst [vmem:[#allocation5 + $0x28] sm:$0xff] %v137_v4 }
  0x95   :  { %219 = vst [vmem:[#allocation5 + $0x20] sm:$0xff] %v105_v5 }
  0x97   :  { %v138_v6 = vpop.trf.xlu1 }
  0x98   :  { %v106_v7 = vpop.trf.xlu0  ;;  %222 = vst [vmem:[#allocation5 + $0x38] sm:$0xff] %v138_v6 }
  0x99   :  { %221 = vst [vmem:[#allocation5 + $0x30] sm:$0xff] %v106_v7 }
  0x9b   :  { %v139_v8 = vpop.trf.xlu1 }
  0x9c   :  { %v107_v9 = vpop.trf.xlu0  ;;  %224 = vst [vmem:[#allocation5 + $0x48] sm:$0xff] %v139_v8 }
  0x9d   :  { %223 = vst [vmem:[#allocation5 + $0x40] sm:$0xff] %v107_v9 }
  0x9f   :  { %v140_v10 = vpop.trf.xlu1 }
  0xa0   :  { %v108_v11 = vpop.trf.xlu0  ;;  %226 = vst [vmem:[#allocation5 + $0x58] sm:$0xff] %v140_v10 }
  0xa1   :  { %225 = vst [vmem:[#allocation5 + $0x50] sm:$0xff] %v108_v11 }
  0xa3   :  { %v141_v12 = vpop.trf.xlu1 }
  0xa4   :  { %v109_v13 = vpop.trf.xlu0  ;;  %228 = vst [vmem:[#allocation5 + $0x68] sm:$0xff] %v141_v12 }
  0xa5   :  { %227 = vst [vmem:[#allocation5 + $0x60] sm:$0xff] %v109_v13 }
  0xa7   :  { %v142_v14 = vpop.trf.xlu1 }
  0xa8   :  { %v110_v15 = vpop.trf.xlu0  ;;  %230 = vst [vmem:[#allocation5 + $0x78] sm:$0xff] %v142_v14 }
  0xa9   :  { %229 = vst [vmem:[#allocation5 + $0x70] sm:$0xff] %v110_v15 }
  0xab   :  { %v143_v16 = vpop.trf.xlu1 }
  0xac   :  { %v111_v17 = vpop.trf.xlu0  ;;  %232 = vst [vmem:[#allocation5 + $0x88] sm:$0xff] %v143_v16 }
  0xad   :  { %231 = vst [vmem:[#allocation5 + $0x80] sm:$0xff] %v111_v17 }
  0xaf   :  { %v144_v18 = vpop.trf.xlu1 }
  0xb0   :  { %v112_v19 = vpop.trf.xlu0  ;;  %234 = vst [vmem:[#allocation5 + $0x98] sm:$0xff] %v144_v18 }
  0xb1   :  { %233 = vst [vmem:[#allocation5 + $0x90] sm:$0xff] %v112_v19 }
  0xb3   :  { %v145_v20 = vpop.trf.xlu1 }
  0xb4   :  { %v113_v21 = vpop.trf.xlu0  ;;  %236 = vst [vmem:[#allocation5 + $0xa8] sm:$0xff] %v145_v20 }
  0xb5   :  { %235 = vst [vmem:[#allocation5 + $0xa0] sm:$0xff] %v113_v21 }
  0xb7   :  { %v146_v22 = vpop.trf.xlu1 }
  0xb8   :  { %v114_v23 = vpop.trf.xlu0  ;;  %238 = vst [vmem:[#allocation5 + $0xb8] sm:$0xff] %v146_v22 }
  0xb9   :  { %237 = vst [vmem:[#allocation5 + $0xb0] sm:$0xff] %v114_v23 }
  0xbb   :  { %v147_v24 = vpop.trf.xlu1 }
  0xbc   :  { %v115_v25 = vpop.trf.xlu0  ;;  %240 = vst [vmem:[#allocation5 + $0xc8] sm:$0xff] %v147_v24 }
  0xbd   :  { %239 = vst [vmem:[#allocation5 + $0xc0] sm:$0xff] %v115_v25 }
  0xbf   :  { %v148_v26 = vpop.trf.xlu1 }
  0xc0   :  { %v116_v27 = vpop.trf.xlu0  ;;  %242 = vst [vmem:[#allocation5 + $0xd8] sm:$0xff] %v148_v26 }
  0xc1   :  { %241 = vst [vmem:[#allocation5 + $0xd0] sm:$0xff] %v116_v27 }
  0xc3   :  { %v149_v28 = vpop.trf.xlu1 }
  0xc4   :  { %v117_v29 = vpop.trf.xlu0  ;;  %244 = vst [vmem:[#allocation5 + $0xe8] sm:$0xff] %v149_v28 }
  0xc5   :  { %243 = vst [vmem:[#allocation5 + $0xe0] sm:$0xff] %v117_v29 }
  0xc7   :  { %v150_v30 = vpop.trf.xlu1 }
  0xc8   :  { %v118_v31 = vpop.trf.xlu0  ;;  %246 = vst [vmem:[#allocation5 + $0xf8] sm:$0xff] %v150_v30 }
  0xc9   :  { %245 = vst [vmem:[#allocation5 + $0xf0] sm:$0xff] %v118_v31 }
  0xcb   :  { %v199_v32 = vpop.trf.xlu1 }
  0xcc   :  { %v167_v33 = vpop.trf.xlu0  ;;  %248 = vst [vmem:[#allocation5 + $0x108] sm:$0xff] %v199_v32 }
  0xcd   :  { %247 = vst [vmem:[#allocation5 + $0x100] sm:$0xff] %v167_v33 }
  0xcf   :  { %v200_v34 = vpop.trf.xlu1 }
  0xd0   :  { %v168_v35 = vpop.trf.xlu0  ;;  %250 = vst [vmem:[#allocation5 + $0x118] sm:$0xff] %v200_v34 }
  0xd1   :  { %249 = vst [vmem:[#allocation5 + $0x110] sm:$0xff] %v168_v35 }
  0xd3   :  { %v201_v36 = vpop.trf.xlu1 }
  0xd4   :  { %v169_v37 = vpop.trf.xlu0  ;;  %252 = vst [vmem:[#allocation5 + $0x128] sm:$0xff] %v201_v36 }
  0xd5   :  { %251 = vst [vmem:[#allocation5 + $0x120] sm:$0xff] %v169_v37 }
  0xd7   :  { %v202_v38 = vpop.trf.xlu1 }
  0xd8   :  { %v170_v39 = vpop.trf.xlu0  ;;  %254 = vst [vmem:[#allocation5 + $0x138] sm:$0xff] %v202_v38 }
  0xd9   :  { %253 = vst [vmem:[#allocation5 + $0x130] sm:$0xff] %v170_v39 }
  0xdb   :  { %v203_v40 = vpop.trf.xlu1 }
  0xdc   :  { %v171_v41 = vpop.trf.xlu0  ;;  %256 = vst [vmem:[#allocation5 + $0x148] sm:$0xff] %v203_v40 }
  0xdd   :  { %255 = vst [vmem:[#allocation5 + $0x140] sm:$0xff] %v171_v41 }
  0xdf   :  { %v204_v42 = vpop.trf.xlu1 }
  0xe0   :  { %v172_v43 = vpop.trf.xlu0  ;;  %258 = vst [vmem:[#allocation5 + $0x158] sm:$0xff] %v204_v42 }
  0xe1   :  { %257 = vst [vmem:[#allocation5 + $0x150] sm:$0xff] %v172_v43 }
  0xe3   :  { %v205_v44 = vpop.trf.xlu1 }
  0xe4   :  { %v173_v45 = vpop.trf.xlu0  ;;  %260 = vst [vmem:[#allocation5 + $0x168] sm:$0xff] %v205_v44 }
  0xe5   :  { %259 = vst [vmem:[#allocation5 + $0x160] sm:$0xff] %v173_v45 }
  0xe7   :  { %v206_v46 = vpop.trf.xlu1 }
  0xe8   :  { %v174_v47 = vpop.trf.xlu0  ;;  %262 = vst [vmem:[#allocation5 + $0x178] sm:$0xff] %v206_v46 }
  0xe9   :  { %261 = vst [vmem:[#allocation5 + $0x170] sm:$0xff] %v174_v47 }
  0xeb   :  { %v207_v48 = vpop.trf.xlu1 }
  0xec   :  { %v175_v49 = vpop.trf.xlu0  ;;  %264 = vst [vmem:[#allocation5 + $0x188] sm:$0xff] %v207_v48 }
  0xed   :  { %263 = vst [vmem:[#allocation5 + $0x180] sm:$0xff] %v175_v49 }
  0xef   :  { %v208_v50 = vpop.trf.xlu1 }
  0xf0   :  { %v176_v51 = vpop.trf.xlu0  ;;  %266 = vst [vmem:[#allocation5 + $0x198] sm:$0xff] %v208_v50 }
  0xf1   :  { %265 = vst [vmem:[#allocation5 + $0x190] sm:$0xff] %v176_v51 }
  0xf3   :  { %v209_v52 = vpop.trf.xlu1 }
  0xf4   :  { %v177_v53 = vpop.trf.xlu0  ;;  %268 = vst [vmem:[#allocation5 + $0x1a8] sm:$0xff] %v209_v52 }
  0xf5   :  { %267 = vst [vmem:[#allocation5 + $0x1a0] sm:$0xff] %v177_v53 }
  0xf7   :  { %v210_v54 = vpop.trf.xlu1 }
  0xf8   :  { %v178_v55 = vpop.trf.xlu0  ;;  %270 = vst [vmem:[#allocation5 + $0x1b8] sm:$0xff] %v210_v54 }
  0xf9   :  { %269 = vst [vmem:[#allocation5 + $0x1b0] sm:$0xff] %v178_v55 }
  0xfb   :  { %v211_v56 = vpop.trf.xlu1 }
  0xfc   :  { %v179_v57 = vpop.trf.xlu0  ;;  %272 = vst [vmem:[#allocation5 + $0x1c8] sm:$0xff] %v211_v56 }
  0xfd   :  { %271 = vst [vmem:[#allocation5 + $0x1c0] sm:$0xff] %v179_v57 }
  0xff   :  { %v212_v58 = vpop.trf.xlu1 }
 0x100   :  { %v180_v59 = vpop.trf.xlu0  ;;  %274 = vst [vmem:[#allocation5 + $0x1d8] sm:$0xff] %v212_v58 }
 0x101   :  { %273 = vst [vmem:[#allocation5 + $0x1d0] sm:$0xff] %v180_v59 }
 0x103   :  { %v213_v60 = vpop.trf.xlu1 }
 0x104   :  { %v181_v61 = vpop.trf.xlu0  ;;  %276 = vst [vmem:[#allocation5 + $0x1e8] sm:$0xff] %v213_v60 }
 0x105   :  { %275 = vst [vmem:[#allocation5 + $0x1e0] sm:$0xff] %v181_v61 }
 0x107   :  { %v214_v62 = vpop.trf.xlu1 }
 0x108   :  { %v182_v63 = vpop.trf.xlu0  ;;  %278 = vst [vmem:[#allocation5 + $0x1f8] sm:$0xff] %v214_v62 }
 0x109   :  { %277 = vst [vmem:[#allocation5 + $0x1f0] sm:$0xff] %v182_v63 }
 0x10a   :  { %333 = shalt.err (!%p330_p9)
}
 0x10b   :  { %s350_s15 = smov 256   ;;  %s351_s16 = smov 16  }
 0x10c   :  { %290 = dma.vmem_to_hbm [thread:$0]  %s285_s13, 8192, %s369_s1, [#allocation4], %s350_s15, %s350_s15, %s351_s16  }
 0x10d   :  { %344 = dma.done.wait [#allocation4], 8192  }
 0x10e   :  { %345 = vsyncadd [#allocation4], 4294959104 }
 0x10f   :  { %294 = vsyncpa [#allocation3], 1 }
 0x110   :  { %295 = vsyncpa [#allocation4], 1 }

</bundles_post_ra>
